<compile_context>
chip_gen: v6e
topology: v6e:2x2x1
jax: 0.10.0
libtpu: 0.0.40
codegen_flags: <defaults>
</compile_context>

<pallas_src>
import functools

import jax
import jax.numpy as jnp
from jax.experimental import pallas as pl
from jax.experimental.pallas import tpu as pltpu

# Storage/compute dtype for MXU operands (activations are cast right at the dot; accumulation
# is always f32 via preferred_element_type).  Set to jnp.float32 for full-precision matmuls.
MATMUL_DTYPE = jnp.bfloat16

_RES_DILATIONS = (1, 2, 4)


# --------------------------------------------------------------------------------------
# In-kernel helpers (channels-first: activations are (C, T); T maps to the 128-lane axis)
# --------------------------------------------------------------------------------------
def _prelu(x, alpha):
    # x: (C, T) f32, alpha: (C, 1) f32 per-channel slope (broadcast over T lanes)
    return jnp.where(x >= 0, x, x * alpha)


def _conv3_same(h, w, b, d):
    """k=3 dilated 'same' Conv1d as a single MXU matmul.

    h: (Cin, T) f32, w: (Cout, 3*Cin) with columns ordered [k*Cin + ci], k=0 -> x[t-d],
    b: (Cout, 1) f32.  Returns (Cout, T) f32.
    """
    Cin, T = h.shape
    z = jnp.zeros((Cin, d), h.dtype)
    hp = jnp.concatenate([z, h, z], axis=1)                                 # (Cin, T + 2d)
    # taps: x[t-d], x[t], x[t+d] stacked on the sublane (channel) axis -> (3*Cin, T)
    lhs = jnp.concatenate([hp[:, :T], h, hp[:, 2 * d:2 * d + T]], axis=0)
    y = jnp.dot(w, lhs.astype(w.dtype), preferred_element_type=jnp.float32)
    return y + b


# --------------------------------------------------------------------------------------
# Pallas kernels
# --------------------------------------------------------------------------------------
def _fused_convblock_kernel(*refs, first_conv):
    """Fused ConvBlock tail: [PReLU + k=3 conv]? -> 3 residual units -> cond 1x1 projection.

    Input refs: x (1,C,T), [a0 (C,1), w0 (C,3C), b0 (C,1)] if first_conv, then 3x
    [a (C,1), w (C,3C), b (C,1)], cond_w (C,C), cond_b (C,1).
    Output refs: x_out (1,C,T), cond (1,C,T).
    The activation stays resident in VMEM/vregs for the whole block: no HBM round trips
    between sub-layers and a single kernel launch per block.
    """
    x_out_ref, cond_ref = refs[-2], refs[-1]
    ins = refs[:-2]
    x = ins[0][0].astype(jnp.float32)                                       # (C, T)
    i = 1
    if first_conv:
        a0, w0, b0 = ins[i], ins[i + 1], ins[i + 2]
        i += 3
        x = _conv3_same(_prelu(x, a0[...]), w0[...], b0[...], 1)            # no residual
    for d in _RES_DILATIONS:
        a, w, b = ins[i], ins[i + 1], ins[i + 2]
        i += 3
        x = x + _conv3_same(_prelu(x, a[...]), w[...], b[...], d)           # residual unit
    cond_w, cond_b = ins[i], ins[i + 1]
    x_out_ref[0] = x.astype(x_out_ref.dtype)
    cond = jnp.dot(cond_w[...], x.astype(cond_w[...].dtype),
                   preferred_element_type=jnp.float32) + cond_b[...]
    cond_ref[0] = cond.astype(cond_ref.dtype)


def _prelu_tconv_kernel(x_ref, a_ref, w_ref, b_ref, o_ref):
    """Fused PReLU -> ConvTranspose1d with kernel == stride == r (pure matmul per time step).

    x_ref: (1, Cin, tT), a_ref: (Cin, 1), w_ref: (r*Cout, Cin), b_ref: (r*Cout, 1).
    Output (1, r*Cout, tT); phase interleave (r*Cout, T) -> (Cout, T*r) is done by the wrapper.
    """
    x = x_ref[0].astype(jnp.float32)
    h = _prelu(x, a_ref[...])
    w = w_ref[...]
    y = jnp.dot(w, h.astype(w.dtype), preferred_element_type=jnp.float32) + b_ref[...]
    o_ref[0] = y.astype(o_ref.dtype)


# --------------------------------------------------------------------------------------
# pallas_call wrappers
# --------------------------------------------------------------------------------------
def _rep_spec(arr):
    """Whole-array block, replicated across the (single) batch grid axis."""
    shp = arr.shape
    zeros = (0,) * len(shp)
    return pl.BlockSpec(shp, lambda *_: zeros)


def _pick_time_tile(t, cap=1024):
    """Largest 128-multiple <= cap dividing t (keeps blocks lane-aligned), else full t."""
    for tt in (cap, 512, 256, 128):
        if t >= tt and t % tt == 0:
            return tt
    return t


def fused_conv_block(x, p, *, first_conv):
    """x: (B, C, T) channels-first.  One pallas_call for the whole ConvBlock tail."""
    B, C, T = x.shape
    args = [x]
    specs = [pl.BlockSpec((1, C, T), lambda b: (b, 0, 0))]
    params = []
    if first_conv:
        params += [p["act0_alpha"], p["rc_w"], p["rc_b"]]
    for alpha, w, b in p["res"]:
        params += [alpha, w, b]
    params += [p["cond_w"], p["cond_b"]]
    for a in params:
        args.append(a)
        specs.append(_rep_spec(a))
    kern = functools.partial(_fused_convblock_kernel, first_conv=first_conv)
    x_out, cond = pl.pallas_call(
        kern,
        out_shape=(jax.ShapeDtypeStruct((B, C, T), x.dtype),
                   jax.ShapeDtypeStruct((B, C, T), x.dtype)),
        grid=(B,),
        in_specs=specs,
        out_specs=(pl.BlockSpec((1, C, T), lambda b: (b, 0, 0)),
                   pl.BlockSpec((1, C, T), lambda b: (b, 0, 0))),
        compiler_params=pltpu.CompilerParams(dimension_semantics=("parallel",)),
    )(*args)
    return x_out, cond


def prelu_transposed_conv(x, alpha, w2, b2, r, cout):
    """x: (B, Cin, T), w2: (r*Cout, Cin) pre-laid-out at init, b2: (r*Cout, 1).

    kernel == stride == r -> one matmul; returns the upsampled (B, Cout, T*r)."""
    B, cin, T = x.shape
    tT = _pick_time_tile(T)
    out = pl.pallas_call(
        _prelu_tconv_kernel,
        out_shape=jax.ShapeDtypeStruct((B, r * cout, T), x.dtype),
        grid=(B, T // tT),
        in_specs=[
            pl.BlockSpec((1, cin, tT), lambda b, t: (b, 0, t)),
            pl.BlockSpec((cin, 1), lambda b, t: (0, 0)),
            pl.BlockSpec((r * cout, cin), lambda b, t: (0, 0)),
            pl.BlockSpec((r * cout, 1), lambda b, t: (0, 0)),
        ],
        out_specs=pl.BlockSpec((1, r * cout, tT), lambda b, t: (b, 0, t)),
        compiler_params=pltpu.CompilerParams(dimension_semantics=("parallel", "parallel")),
    )(x, alpha, w2, b2)
    # phase interleave: out[b, j*Cout+co, t] -> up[b, co, t*r + j]
    up = out.reshape(B, r, cout, T).transpose(0, 2, 3, 1).reshape(B, cout, T * r)
    return up


# --------------------------------------------------------------------------------------
# ConvBlock / ConditionerDecoder (parameters + forward glue)
# --------------------------------------------------------------------------------------
def _init_conv_block(key, n_channels, r=1, up_down=None, scale=0.1):
    keys = jax.random.split(key, 12)
    if up_down == "up":
        in_ch, out_ch = 2 * n_channels, n_channels
        # PyTorch ConvTranspose1d weight (Cin, Cout, r) -> pre-laid-out (r*Cout, Cin)
        w_t = scale * jax.random.normal(keys[0], (in_ch, out_ch, r), jnp.float32)
        rc_w = jnp.transpose(w_t, (2, 1, 0)).reshape(r * out_ch, in_ch).astype(MATMUL_DTYPE)
        b = scale * jax.random.normal(keys[1], (out_ch,), jnp.float32)
        rc_b = jnp.tile(b, (r,)).reshape(r * out_ch, 1)                     # tiled once, at init
    else:
        in_ch = out_ch = n_channels
        # PyTorch Conv1d weight (Cout, Cin, 3) -> tap-fused (Cout, 3*Cin)
        w_t = scale * jax.random.normal(keys[0], (out_ch, in_ch, 3), jnp.float32)
        rc_w = jnp.transpose(w_t, (0, 2, 1)).reshape(out_ch, 3 * in_ch).astype(MATMUL_DTYPE)
        rc_b = (scale * jax.random.normal(keys[1], (out_ch,), jnp.float32)).reshape(out_ch, 1)
    act0_alpha = jnp.full((in_ch, 1), 0.25, jnp.float32)   # PyTorch PReLU default slope
    res = []
    for i in range(len(_RES_DILATIONS)):
        alpha = jnp.full((out_ch, 1), 0.25, jnp.float32)
        w_t = scale * jax.random.normal(keys[2 + 2 * i], (out_ch, out_ch, 3), jnp.float32)
        w = jnp.transpose(w_t, (0, 2, 1)).reshape(out_ch, 3 * out_ch).astype(MATMUL_DTYPE)
        b = (scale * jax.random.normal(keys[3 + 2 * i], (out_ch,), jnp.float32)).reshape(out_ch, 1)
        res.append((alpha, w, b))
    cond_w = (scale * jax.random.normal(keys[8], (out_ch, out_ch), jnp.float32)).astype(MATMUL_DTYPE)
    cond_b = (scale * jax.random.normal(keys[9], (out_ch,), jnp.float32)).reshape(out_ch, 1)
    return dict(up_down=up_down, r=r, out_ch=out_ch, act0_alpha=act0_alpha,
                rc_w=rc_w, rc_b=rc_b, res=res, cond_w=cond_w, cond_b=cond_b)


def conv_block_forward(p, x, length=None):
    """x: (B, C, T) channels-first (PyTorch NCL).  Returns (x, length, cond)."""
    if p["up_down"] == "up":
        x = prelu_transposed_conv(x, p["act0_alpha"], p["rc_w"], p["rc_b"], p["r"], p["out_ch"])
        if length is not None:
            x = x[:, :, :length]                     # crop to the encoder-recorded length
        x, cond = fused_conv_block(x, p, first_conv=False)
    else:
        x, cond = fused_conv_block(x, p, first_conv=True)
    return x, length, cond


def init_conditioner_decoder(key, up_factors, input_channels, with_extra_conv_block=False):
    n_channels = [input_channels * 2 ** (len(up_factors) - i - 1) for i in range(len(up_factors))]
    keys = jax.random.split(key, len(up_factors) + 2)
    params = {"input_conv_block": _init_conv_block(keys[0], n_channels[0] * 2, up_down=None)}
    ups = []
    if with_extra_conv_block:
        ups.append(_init_conv_block(keys[-1], 2 * n_channels[0], up_down=None))
    for i, (c, r) in enumerate(zip(n_channels, up_factors)):
        ups.append(_init_conv_block(keys[i + 1], c, r=r, up_down="up"))
    params["up_modules"] = ups
    return params


def conditioner_decoder_forward(params, x_ncl, lengths):
    """x_ncl: (B, 2*n_channels[0], T) in PyTorch NCL layout; lengths: one int per up module."""
    x, *_ = conv_block_forward(params["input_conv_block"], x_ncl)
    conditions = []
    for up_p, length in zip(params["up_modules"], lengths):
        x, _, cond = conv_block_forward(up_p, x, length=length)
        conditions.append(cond)                      # already (B, C, T): no transpose needed
    return x, conditions


# --------------------------------------------------------------------------------------
if __name__ == "__main__":
    key = jax.random.PRNGKey(0)
    k_params, k_x = jax.random.split(key)

    up_factors = [2, 2]
    input_channels = 8
    B, T0 = 2, 16
    n0 = input_channels * 2 ** (len(up_factors) - 1)          # 16
    in_ch = 2 * n0                                             # decoder input channels = 32

    params = init_conditioner_decoder(k_params, up_factors, input_channels)
    x = jax.random.normal(k_x, (B, in_ch, T0), dtype=jnp.float32)   # PyTorch NCL input
    lengths = [30, 59]                                         # per-stage target lengths (<= T*r)

    out, conds = conditioner_decoder_forward(params, x, lengths)
    out = jax.block_until_ready(out)
    conds = [jax.block_until_ready(c) for c in conds]

    assert out.shape == (B, input_channels, lengths[-1])
    assert conds[0].shape == (B, n0, lengths[0])
    assert conds[1].shape == (B, input_channels, lengths[1])
    print("KERNEL_OK")
</pallas_src>

<mosaic_0001>
module attributes {stable_mosaic.version = 11 : i64} {
  func.func @_fused_convblock_kernel(%arg0: i32, %arg1: memref<1x32x16xf32, #tpu.memory_space<vmem>>, %arg2: memref<32x1xf32, #tpu.memory_space<vmem>>, %arg3: memref<32x96xbf16, #tpu.memory_space<vmem>>, %arg4: memref<32x1xf32, #tpu.memory_space<vmem>>, %arg5: memref<32x1xf32, #tpu.memory_space<vmem>>, %arg6: memref<32x96xbf16, #tpu.memory_space<vmem>>, %arg7: memref<32x1xf32, #tpu.memory_space<vmem>>, %arg8: memref<32x1xf32, #tpu.memory_space<vmem>>, %arg9: memref<32x96xbf16, #tpu.memory_space<vmem>>, %arg10: memref<32x1xf32, #tpu.memory_space<vmem>>, %arg11: memref<32x1xf32, #tpu.memory_space<vmem>>, %arg12: memref<32x96xbf16, #tpu.memory_space<vmem>>, %arg13: memref<32x1xf32, #tpu.memory_space<vmem>>, %arg14: memref<32x32xbf16, #tpu.memory_space<vmem>>, %arg15: memref<32x1xf32, #tpu.memory_space<vmem>>, %arg16: memref<1x32x16xf32, #tpu.memory_space<vmem>>, %arg17: memref<1x32x16xf32, #tpu.memory_space<vmem>>) attributes {dimension_semantics = [#tpu.dimension_semantics<parallel>], iteration_bounds = array<i64: 2>, scalar_prefetch = 0 : i64, scratch_operands = 0 : i64, tpu.core_type = #tpu.core_type<tc>, window_params = [{transform_indices = @transform_0, window_bounds = array<i64: 1, 32, 16>}, {pipeline_mode = #tpu.pipeline_mode<synchronous>, transform_indices = @transform_1, window_bounds = array<i64: 32, 1>}, {pipeline_mode = #tpu.pipeline_mode<synchronous>, transform_indices = @transform_2, window_bounds = array<i64: 32, 96>}, {pipeline_mode = #tpu.pipeline_mode<synchronous>, transform_indices = @transform_3, window_bounds = array<i64: 32, 1>}, {pipeline_mode = #tpu.pipeline_mode<synchronous>, transform_indices = @transform_4, window_bounds = array<i64: 32, 1>}, {pipeline_mode = #tpu.pipeline_mode<synchronous>, transform_indices = @transform_5, window_bounds = array<i64: 32, 96>}, {pipeline_mode = #tpu.pipeline_mode<synchronous>, transform_indices = @transform_6, window_bounds = array<i64: 32, 1>}, {pipeline_mode = #tpu.pipeline_mode<synchronous>, transform_indices = @transform_7, window_bounds = array<i64: 32, 1>}, {pipeline_mode = #tpu.pipeline_mode<synchronous>, transform_indices = @transform_8, window_bounds = array<i64: 32, 96>}, {pipeline_mode = #tpu.pipeline_mode<synchronous>, transform_indices = @transform_9, window_bounds = array<i64: 32, 1>}, {pipeline_mode = #tpu.pipeline_mode<synchronous>, transform_indices = @transform_10, window_bounds = array<i64: 32, 1>}, {pipeline_mode = #tpu.pipeline_mode<synchronous>, transform_indices = @transform_11, window_bounds = array<i64: 32, 96>}, {pipeline_mode = #tpu.pipeline_mode<synchronous>, transform_indices = @transform_12, window_bounds = array<i64: 32, 1>}, {pipeline_mode = #tpu.pipeline_mode<synchronous>, transform_indices = @transform_13, window_bounds = array<i64: 32, 32>}, {pipeline_mode = #tpu.pipeline_mode<synchronous>, transform_indices = @transform_14, window_bounds = array<i64: 32, 1>}, {transform_indices = @transform_15, window_bounds = array<i64: 1, 32, 16>}, {transform_indices = @transform_16, window_bounds = array<i64: 1, 32, 16>}]} {
    %c0 = arith.constant 0 : index
    %c0_0 = arith.constant 0 : index
    %c0_1 = arith.constant 0 : index
    %0 = vector.load %arg1[%c0, %c0_0, %c0_1] : memref<1x32x16xf32, #tpu.memory_space<vmem>>, vector<1x32x16xf32>
    %1 = vector.shape_cast %0 : vector<1x32x16xf32> to vector<32x16xf32>
    %c0_2 = arith.constant 0 : index
    %c0_3 = arith.constant 0 : index
    %2 = vector.load %arg2[%c0_2, %c0_3] : memref<32x1xf32, #tpu.memory_space<vmem>>, vector<32x1xf32>
    %cst = arith.constant 0.000000e+00 : f32
    %3 = vector.broadcast %cst : f32 to vector<32x16xf32>
    %4 = arith.cmpf oge, %1, %3 : vector<32x16xf32>
    %5 = vector.broadcast %2 : vector<32x1xf32> to vector<32x16xf32>
    %6 = arith.mulf %1, %5 : vector<32x16xf32>
    %7 = arith.select %4, %1, %6 : vector<32x16xi1>, vector<32x16xf32>
    %c0_4 = arith.constant 0 : index
    %c0_5 = arith.constant 0 : index
    %8 = vector.load %arg3[%c0_4, %c0_5] : memref<32x96xbf16, #tpu.memory_space<vmem>>, vector<32x96xbf16>
    %c0_6 = arith.constant 0 : index
    %c0_7 = arith.constant 0 : index
    %9 = vector.load %arg4[%c0_6, %c0_7] : memref<32x1xf32, #tpu.memory_space<vmem>>, vector<32x1xf32>
    %cst_8 = arith.constant 0.000000e+00 : f32
    %10 = vector.broadcast %cst_8 : f32 to vector<32x1xf32>
    %11 = tpu.concatenate %10, %7, %10 in 1 : vector<32x1xf32>, vector<32x16xf32>, vector<32x1xf32> -> vector<32x18xf32>
    %12 = vector.extract_strided_slice %11 {offsets = [0, 0], sizes = [32, 16], strides = [1, 1]} : vector<32x18xf32> to vector<32x16xf32>
    %13 = vector.extract_strided_slice %11 {offsets = [0, 2], sizes = [32, 16], strides = [1, 1]} : vector<32x18xf32> to vector<32x16xf32>
    %14 = tpu.concatenate %12, %7, %13 in 0 : vector<32x16xf32>, vector<32x16xf32>, vector<32x16xf32> -> vector<96x16xf32>
    %15 = arith.truncf %14 : vector<96x16xf32> to vector<96x16xbf16>
    %cst_9 = arith.constant dense<0.000000e+00> : vector<32x16xf32>
    %16 = tpu.matmul %8, %15, %cst_9 {dimension_numbers = #tpu.dot_dimension_numbers<[1], [0], [0], [1], [0, 0, 1, 1], [], []>} : vector<32x96xbf16>, vector<96x16xbf16>, vector<32x16xf32> -> vector<32x16xf32>
    %17 = vector.broadcast %9 : vector<32x1xf32> to vector<32x16xf32>
    %18 = arith.addf %16, %17 : vector<32x16xf32>
    %c0_10 = arith.constant 0 : index
    %c0_11 = arith.constant 0 : index
    %19 = vector.load %arg5[%c0_10, %c0_11] : memref<32x1xf32, #tpu.memory_space<vmem>>, vector<32x1xf32>
    %cst_12 = arith.constant 0.000000e+00 : f32
    %20 = vector.broadcast %cst_12 : f32 to vector<32x16xf32>
    %21 = arith.cmpf oge, %18, %20 : vector<32x16xf32>
    %22 = vector.broadcast %19 : vector<32x1xf32> to vector<32x16xf32>
    %23 = arith.mulf %18, %22 : vector<32x16xf32>
    %24 = arith.select %21, %18, %23 : vector<32x16xi1>, vector<32x16xf32>
    %c0_13 = arith.constant 0 : index
    %c0_14 = arith.constant 0 : index
    %25 = vector.load %arg6[%c0_13, %c0_14] : memref<32x96xbf16, #tpu.memory_space<vmem>>, vector<32x96xbf16>
    %c0_15 = arith.constant 0 : index
    %c0_16 = arith.constant 0 : index
    %26 = vector.load %arg7[%c0_15, %c0_16] : memref<32x1xf32, #tpu.memory_space<vmem>>, vector<32x1xf32>
    %cst_17 = arith.constant 0.000000e+00 : f32
    %27 = vector.broadcast %cst_17 : f32 to vector<32x1xf32>
    %28 = tpu.concatenate %27, %24, %27 in 1 : vector<32x1xf32>, vector<32x16xf32>, vector<32x1xf32> -> vector<32x18xf32>
    %29 = vector.extract_strided_slice %28 {offsets = [0, 0], sizes = [32, 16], strides = [1, 1]} : vector<32x18xf32> to vector<32x16xf32>
    %30 = vector.extract_strided_slice %28 {offsets = [0, 2], sizes = [32, 16], strides = [1, 1]} : vector<32x18xf32> to vector<32x16xf32>
    %31 = tpu.concatenate %29, %24, %30 in 0 : vector<32x16xf32>, vector<32x16xf32>, vector<32x16xf32> -> vector<96x16xf32>
    %32 = arith.truncf %31 : vector<96x16xf32> to vector<96x16xbf16>
    %cst_18 = arith.constant dense<0.000000e+00> : vector<32x16xf32>
    %33 = tpu.matmul %25, %32, %cst_18 {dimension_numbers = #tpu.dot_dimension_numbers<[1], [0], [0], [1], [0, 0, 1, 1], [], []>} : vector<32x96xbf16>, vector<96x16xbf16>, vector<32x16xf32> -> vector<32x16xf32>
    %34 = vector.broadcast %26 : vector<32x1xf32> to vector<32x16xf32>
    %35 = arith.addf %33, %34 : vector<32x16xf32>
    %36 = arith.addf %18, %35 : vector<32x16xf32>
    %c0_19 = arith.constant 0 : index
    %c0_20 = arith.constant 0 : index
    %37 = vector.load %arg8[%c0_19, %c0_20] : memref<32x1xf32, #tpu.memory_space<vmem>>, vector<32x1xf32>
    %cst_21 = arith.constant 0.000000e+00 : f32
    %38 = vector.broadcast %cst_21 : f32 to vector<32x16xf32>
    %39 = arith.cmpf oge, %36, %38 : vector<32x16xf32>
    %40 = vector.broadcast %37 : vector<32x1xf32> to vector<32x16xf32>
    %41 = arith.mulf %36, %40 : vector<32x16xf32>
    %42 = arith.select %39, %36, %41 : vector<32x16xi1>, vector<32x16xf32>
    %c0_22 = arith.constant 0 : index
    %c0_23 = arith.constant 0 : index
    %43 = vector.load %arg9[%c0_22, %c0_23] : memref<32x96xbf16, #tpu.memory_space<vmem>>, vector<32x96xbf16>
    %c0_24 = arith.constant 0 : index
    %c0_25 = arith.constant 0 : index
    %44 = vector.load %arg10[%c0_24, %c0_25] : memref<32x1xf32, #tpu.memory_space<vmem>>, vector<32x1xf32>
    %cst_26 = arith.constant 0.000000e+00 : f32
    %45 = vector.broadcast %cst_26 : f32 to vector<32x2xf32>
    %46 = tpu.concatenate %45, %42, %45 in 1 : vector<32x2xf32>, vector<32x16xf32>, vector<32x2xf32> -> vector<32x20xf32>
    %47 = vector.extract_strided_slice %46 {offsets = [0, 0], sizes = [32, 16], strides = [1, 1]} : vector<32x20xf32> to vector<32x16xf32>
    %48 = vector.extract_strided_slice %46 {offsets = [0, 4], sizes = [32, 16], strides = [1, 1]} : vector<32x20xf32> to vector<32x16xf32>
    %49 = tpu.concatenate %47, %42, %48 in 0 : vector<32x16xf32>, vector<32x16xf32>, vector<32x16xf32> -> vector<96x16xf32>
    %50 = arith.truncf %49 : vector<96x16xf32> to vector<96x16xbf16>
    %cst_27 = arith.constant dense<0.000000e+00> : vector<32x16xf32>
    %51 = tpu.matmul %43, %50, %cst_27 {dimension_numbers = #tpu.dot_dimension_numbers<[1], [0], [0], [1], [0, 0, 1, 1], [], []>} : vector<32x96xbf16>, vector<96x16xbf16>, vector<32x16xf32> -> vector<32x16xf32>
    %52 = vector.broadcast %44 : vector<32x1xf32> to vector<32x16xf32>
    %53 = arith.addf %51, %52 : vector<32x16xf32>
    %54 = arith.addf %36, %53 : vector<32x16xf32>
    %c0_28 = arith.constant 0 : index
    %c0_29 = arith.constant 0 : index
    %55 = vector.load %arg11[%c0_28, %c0_29] : memref<32x1xf32, #tpu.memory_space<vmem>>, vector<32x1xf32>
    %cst_30 = arith.constant 0.000000e+00 : f32
    %56 = vector.broadcast %cst_30 : f32 to vector<32x16xf32>
    %57 = arith.cmpf oge, %54, %56 : vector<32x16xf32>
    %58 = vector.broadcast %55 : vector<32x1xf32> to vector<32x16xf32>
    %59 = arith.mulf %54, %58 : vector<32x16xf32>
    %60 = arith.select %57, %54, %59 : vector<32x16xi1>, vector<32x16xf32>
    %c0_31 = arith.constant 0 : index
    %c0_32 = arith.constant 0 : index
    %61 = vector.load %arg12[%c0_31, %c0_32] : memref<32x96xbf16, #tpu.memory_space<vmem>>, vector<32x96xbf16>
    %c0_33 = arith.constant 0 : index
    %c0_34 = arith.constant 0 : index
    %62 = vector.load %arg13[%c0_33, %c0_34] : memref<32x1xf32, #tpu.memory_space<vmem>>, vector<32x1xf32>
    %cst_35 = arith.constant 0.000000e+00 : f32
    %63 = vector.broadcast %cst_35 : f32 to vector<32x4xf32>
    %64 = tpu.concatenate %63, %60, %63 in 1 : vector<32x4xf32>, vector<32x16xf32>, vector<32x4xf32> -> vector<32x24xf32>
    %65 = vector.extract_strided_slice %64 {offsets = [0, 0], sizes = [32, 16], strides = [1, 1]} : vector<32x24xf32> to vector<32x16xf32>
    %66 = vector.extract_strided_slice %64 {offsets = [0, 8], sizes = [32, 16], strides = [1, 1]} : vector<32x24xf32> to vector<32x16xf32>
    %67 = tpu.concatenate %65, %60, %66 in 0 : vector<32x16xf32>, vector<32x16xf32>, vector<32x16xf32> -> vector<96x16xf32>
    %68 = arith.truncf %67 : vector<96x16xf32> to vector<96x16xbf16>
    %cst_36 = arith.constant dense<0.000000e+00> : vector<32x16xf32>
    %69 = tpu.matmul %61, %68, %cst_36 {dimension_numbers = #tpu.dot_dimension_numbers<[1], [0], [0], [1], [0, 0, 1, 1], [], []>} : vector<32x96xbf16>, vector<96x16xbf16>, vector<32x16xf32> -> vector<32x16xf32>
    %70 = vector.broadcast %62 : vector<32x1xf32> to vector<32x16xf32>
    %71 = arith.addf %69, %70 : vector<32x16xf32>
    %72 = arith.addf %54, %71 : vector<32x16xf32>
    %c0_37 = arith.constant 0 : index
    %c0_38 = arith.constant 0 : index
    %c0_39 = arith.constant 0 : index
    %73 = vector.load %arg16[%c0_37, %c0_38, %c0_39] : memref<1x32x16xf32, #tpu.memory_space<vmem>>, vector<1x32x16xf32>
    %74 = vector.shape_cast %73 : vector<1x32x16xf32> to vector<32x16xf32>
    %75 = vector.shape_cast %72 : vector<32x16xf32> to vector<1x32x16xf32>
    tpu.vector_store %arg16[%c0_37, %c0_38, %c0_39], %75 {strides = array<i32>} : memref<1x32x16xf32, #tpu.memory_space<vmem>>, vector<1x32x16xf32>,
    %c0_40 = arith.constant 0 : index
    %c0_41 = arith.constant 0 : index
    %76 = vector.load %arg14[%c0_40, %c0_41] : memref<32x32xbf16, #tpu.memory_space<vmem>>, vector<32x32xbf16>
    %77 = arith.truncf %72 : vector<32x16xf32> to vector<32x16xbf16>
    %cst_42 = arith.constant dense<0.000000e+00> : vector<32x16xf32>
    %78 = tpu.matmul %76, %77, %cst_42 {dimension_numbers = #tpu.dot_dimension_numbers<[1], [0], [0], [1], [0, 0, 1, 1], [], []>} : vector<32x32xbf16>, vector<32x16xbf16>, vector<32x16xf32> -> vector<32x16xf32>
    %c0_43 = arith.constant 0 : index
    %c0_44 = arith.constant 0 : index
    %79 = vector.load %arg15[%c0_43, %c0_44] : memref<32x1xf32, #tpu.memory_space<vmem>>, vector<32x1xf32>
    %80 = vector.broadcast %79 : vector<32x1xf32> to vector<32x16xf32>
    %81 = arith.addf %78, %80 : vector<32x16xf32>
    %c0_45 = arith.constant 0 : index
    %c0_46 = arith.constant 0 : index
    %c0_47 = arith.constant 0 : index
    %82 = vector.load %arg17[%c0_45, %c0_46, %c0_47] : memref<1x32x16xf32, #tpu.memory_space<vmem>>, vector<1x32x16xf32>
    %83 = vector.shape_cast %82 : vector<1x32x16xf32> to vector<32x16xf32>
    %84 = vector.shape_cast %81 : vector<32x16xf32> to vector<1x32x16xf32>
    tpu.vector_store %arg17[%c0_45, %c0_46, %c0_47], %84 {strides = array<i32>} : memref<1x32x16xf32, #tpu.memory_space<vmem>>, vector<1x32x16xf32>,
    return
  }
  func.func @transform_0(%arg0: i32) -> (i32, i32, i32) {
    %c0_i32 = arith.constant 0 : i32
    %c0_i32_0 = arith.constant 0 : i32
    %c0_i32_1 = arith.constant 0 : i32
    return %arg0, %c0_i32, %c0_i32_0 : i32, i32, i32
  }
  func.func @transform_1(%arg0: i32) -> (i32, i32) {
    %c0_i32 = arith.constant 0 : i32
    %c0_i32_0 = arith.constant 0 : i32
    %c0_i32_1 = arith.constant 0 : i32
    return %c0_i32, %c0_i32_0 : i32, i32
  }
  func.func @transform_2(%arg0: i32) -> (i32, i32) {
    %c0_i32 = arith.constant 0 : i32
    %c0_i32_0 = arith.constant 0 : i32
    %c0_i32_1 = arith.constant 0 : i32
    return %c0_i32, %c0_i32_0 : i32, i32
  }
  func.func @transform_3(%arg0: i32) -> (i32, i32) {
    %c0_i32 = arith.constant 0 : i32
    %c0_i32_0 = arith.constant 0 : i32
    %c0_i32_1 = arith.constant 0 : i32
    return %c0_i32, %c0_i32_0 : i32, i32
  }
  func.func @transform_4(%arg0: i32) -> (i32, i32) {
    %c0_i32 = arith.constant 0 : i32
    %c0_i32_0 = arith.constant 0 : i32
    %c0_i32_1 = arith.constant 0 : i32
    return %c0_i32, %c0_i32_0 : i32, i32
  }
  func.func @transform_5(%arg0: i32) -> (i32, i32) {
    %c0_i32 = arith.constant 0 : i32
    %c0_i32_0 = arith.constant 0 : i32
    %c0_i32_1 = arith.constant 0 : i32
    return %c0_i32, %c0_i32_0 : i32, i32
  }
  func.func @transform_6(%arg0: i32) -> (i32, i32) {
    %c0_i32 = arith.constant 0 : i32
    %c0_i32_0 = arith.constant 0 : i32
    %c0_i32_1 = arith.constant 0 : i32
    return %c0_i32, %c0_i32_0 : i32, i32
  }
  func.func @transform_7(%arg0: i32) -> (i32, i32) {
    %c0_i32 = arith.constant 0 : i32
    %c0_i32_0 = arith.constant 0 : i32
    %c0_i32_1 = arith.constant 0 : i32
    return %c0_i32, %c0_i32_0 : i32, i32
  }
  func.func @transform_8(%arg0: i32) -> (i32, i32) {
    %c0_i32 = arith.constant 0 : i32
    %c0_i32_0 = arith.constant 0 : i32
    %c0_i32_1 = arith.constant 0 : i32
    return %c0_i32, %c0_i32_0 : i32, i32
  }
  func.func @transform_9(%arg0: i32) -> (i32, i32) {
    %c0_i32 = arith.constant 0 : i32
    %c0_i32_0 = arith.constant 0 : i32
    %c0_i32_1 = arith.constant 0 : i32
    return %c0_i32, %c0_i32_0 : i32, i32
  }
  func.func @transform_10(%arg0: i32) -> (i32, i32) {
    %c0_i32 = arith.constant 0 : i32
    %c0_i32_0 = arith.constant 0 : i32
    %c0_i32_1 = arith.constant 0 : i32
    return %c0_i32, %c0_i32_0 : i32, i32
  }
  func.func @transform_11(%arg0: i32) -> (i32, i32) {
    %c0_i32 = arith.constant 0 : i32
    %c0_i32_0 = arith.constant 0 : i32
    %c0_i32_1 = arith.constant 0 : i32
    return %c0_i32, %c0_i32_0 : i32, i32
  }
  func.func @transform_12(%arg0: i32) -> (i32, i32) {
    %c0_i32 = arith.constant 0 : i32
    %c0_i32_0 = arith.constant 0 : i32
    %c0_i32_1 = arith.constant 0 : i32
    return %c0_i32, %c0_i32_0 : i32, i32
  }
  func.func @transform_13(%arg0: i32) -> (i32, i32) {
    %c0_i32 = arith.constant 0 : i32
    %c0_i32_0 = arith.constant 0 : i32
    %c0_i32_1 = arith.constant 0 : i32
    return %c0_i32, %c0_i32_0 : i32, i32
  }
  func.func @transform_14(%arg0: i32) -> (i32, i32) {
    %c0_i32 = arith.constant 0 : i32
    %c0_i32_0 = arith.constant 0 : i32
    %c0_i32_1 = arith.constant 0 : i32
    return %c0_i32, %c0_i32_0 : i32, i32
  }
  func.func @transform_15(%arg0: i32) -> (i32, i32, i32) {
    %c0_i32 = arith.constant 0 : i32
    %c0_i32_0 = arith.constant 0 : i32
    %c0_i32_1 = arith.constant 0 : i32
    return %arg0, %c0_i32, %c0_i32_0 : i32, i32, i32
  }
  func.func @transform_16(%arg0: i32) -> (i32, i32, i32) {
    %c0_i32 = arith.constant 0 : i32
    %c0_i32_0 = arith.constant 0 : i32
    %c0_i32_1 = arith.constant 0 : i32
    return %arg0, %c0_i32, %c0_i32_0 : i32, i32, i32
  }
}

</mosaic_0001>

<bundles_post_ra>
// kernel: tpu_custom_call.1
= control target key start
LH: loop header
LB: loop body
LE: loop exit
PB: predicated region body
PF: predicated region fallthrough
CT: control target
= control target key end

     0   :  { %s1827_s21 = smov 0   ;;  %s2138_s0 = inlined_call_operand.vmem [shape: f32[2,32,16], index: 0, kind: input, shape index: {}]   ;;  %s2139_s1 = inlined_call_operand.vmem [shape: f32[32,1], index: 1, kind: input, shape index: {}]   ;;  %s2140_s2 = inlined_call_operand.vmem [shape: bf16[32,96], index: 2, kind: input, shape index: {}]   ;;  %s2141_s3 = inlined_call_operand.vmem [shape: f32[32,1], index: 3, kind: input, shape index: {}]   ;;  %s2142_s4 = inlined_call_operand.vmem [shape: f32[32,1], index: 4, kind: input, shape index: {}]   ;;  %s2143_s5 = inlined_call_operand.vmem [shape: bf16[32,96], index: 5, kind: input, shape index: {}]   ;;  %s2144_s6 = inlined_call_operand.vmem [shape: f32[32,1], index: 6, kind: input, shape index: {}]   ;;  %s2145_s7 = inlined_call_operand.vmem [shape: f32[32,1], index: 7, kind: input, shape index: {}]   ;;  %s2146_s8 = inlined_call_operand.vmem [shape: bf16[32,96], index: 8, kind: input, shape index: {}]   ;;  %s2147_s9 = inlined_call_operand.vmem [shape: f32[32,1], index: 9, kind: input, shape index: {}]   ;;  %s2148_s10 = inlined_call_operand.vmem [shape: f32[32,1], index: 10, kind: input, shape index: {}]   ;;  %s2149_s11 = inlined_call_operand.vmem [shape: bf16[32,96], index: 11, kind: input, shape index: {}]   ;;  %s2150_s12 = inlined_call_operand.vmem [shape: f32[32,1], index: 12, kind: input, shape index: {}]   ;;  %s2151_s13 = inlined_call_operand.vmem [shape: bf16[32,32], index: 13, kind: input, shape index: {}]   ;;  %s2152_s14 = inlined_call_operand.vmem [shape: f32[32,1], index: 14, kind: input, shape index: {}]   ;;  %s2153_s15 = inlined_call_operand.vmem [shape: f32[2,32,16], index: 15, kind: output, shape index: {0}]   ;;  %s2154_s16 = inlined_call_operand.vmem [shape: f32[2,32,16], index: 16, kind: output, shape index: {1}]  }
   0x1   :  { %2155 = sst [smem:[#allocation2_spill]] %s2138_s0 }
   0x2 LB: > { %s1452_s22 = sadd.s32 4294967295, %s1733_s21   ;;  %p1456_p0 = scmp.ge.s32.totalorder %s1733_s21, 1  ;;  %s1733_s21 = sphi %s1827_s21, %s27_s21  }
   0x3   : > { %p465_p1 = scmp.lt.s32.totalorder %s1733_s21, 3 }
   0x5   : > { %p466_p2 = pnand %p1456_p0, %p465_p1 }
   0x6   : > { %p520_p3 = scmp.lt.s32.totalorder (!%p466_p2), %s1452_s22, 1  ;;  %s2156_s19 = sld [smem:[#allocation2_spill]] (!%p466_p2) }
   0x7   : > { %469 = sbr.rel (%p466_p2) target bundleno = 2232 (0x8b8), region = 80  ;;  %s1737_s23 = smov (!%p466_p2), 126  }
   0x8   : > { %s1738_s28 = smov (!%p466_p2), 2   ;;  %s1739_s29 = smov (!%p466_p2), 124  }
   0x9   : > { %s1740_s24 = smov (!%p466_p2), 4   ;;  %s1741_s25 = smov (!%p466_p2), 120  }
   0xc   : > { %v542_v0 = vld [vmem:[%s2139_s1 + $0x10] sm:$0xff]  ;;  %v540_v1 = vld [vmem:[%s2139_s1] sm:$0xff]  ;;  %v1735_v2 = vmov 0   ;;  %v543_v3 = vld [vmem:[%s2139_s1 + $0x18] sm:$0xff]  ;;  %s2160_s22 = smov (!%p520_p3, %s1452_s22), 1  ;;  %vm600_vm4 = vcmask 7168  }
   0xd   : > { %1636 = vset.pattern.permute.xlu1 %v1735_v2  ;;  %1635 = vset.pattern.permute.xlu0 %v1735_v2  ;;  %v541_v4 = vld [vmem:[%s2139_s1 + $0x8] sm:$0xff]  ;;  %s1847_s0 = sshll.u32 %s2160_s22, 5  ;;  %s1736_s22 = smov 1   ;;  %vm605_vm5 = vcmask 138240   ;;  %v582_v43 = vld [vmem:[%s2141_s3 + $0x10] sm:$0xff]  ;;  %v583_v44 = vld [vmem:[%s2141_s3 + $0x18] sm:$0xff] }
   0xe   : > { %560 = vperm.xlu0 %1635, %v542_v0   ;;  %550 = vperm.xlu1 %1636, %v540_v1   ;;  %s524_s20 = scalar_lea.vmem %s2156_s19, %s1847_s0  ;;  %v720_v45 = vld [vmem:[%s2142_s4 + $0x10] sm:$0xff]  ;;  %v721_v46 = vld [vmem:[%s2142_s4 + $0x18] sm:$0xff]  ;;  %v580_v47 = vld [vmem:[%s2141_s3] sm:$0xff]  ;;  %vm662_vm6 = vcmask 785408  }
   0xf   : > { %v536_v5 = vld [vmem:[%s524_s20] sm:$0xff]  ;;  %v538_v7 = vld [vmem:[%s524_s20 + $0x10] sm:$0xff]  ;;  %v539_v10 = vld [vmem:[%s524_s20 + $0x18] sm:$0xff] }
  0x10   : > { %v537_v11 = vld [vmem:[%s524_s20 + $0x8] sm:$0xff]  ;;  %vm544_vm0 = vcmp.ge.f32.partialorder %v536_v5, 0.0  ;;  %vm546_vm1 = vcmp.ge.f32.partialorder %v538_v7, 0.0  ;;  %vm547_vm2 = vcmp.ge.f32.partialorder %v539_v10, 0.0  ;;  %v1717_v49 = vld [vmem:[%s2140_s2] sm:$0xff]   ;;  %vm1895_vm7 = vmpackc.low %vm605_vm5, %vm605_vm5 }
  0x11   : > { %vm545_vm3 = vcmp.ge.f32.partialorder %v537_v11, 0.0  ;;  %v581_v48 = vld [vmem:[%s2141_s3 + $0x8] sm:$0xff]  ;;  %v718_v50 = vld [vmem:[%s2142_s4] sm:$0xff]  ;;  %1560 = vmatprep.mubr.msk.bf16.mxu0 %vm662_vm6, %v1717_v49  ;;  %v900_v49 = vld [vmem:[%s2145_s7 + $0x18] sm:$0xff] }
  0x12   : > { %565 = vperm.xlu0 %1635, %v543_v3   ;;  %555 = vperm.xlu1 %1636, %v541_v4   ;;  %v719_v51 = vld [vmem:[%s2142_s4 + $0x8] sm:$0xff] }
  0x13   : > { %v1718_v61 = vld [vmem:[%s2140_s2 + $0x8] sm:$0xff]  }
  0x89   : > { %v561_v6 = vpop.permute.xlu0 %560  ;;  %v551_v8 = vpop.permute.xlu1 %550 }
  0x8a   : > { %v568_v9 = vmul.f32 %v551_v8, %v536_v5  ;;  %v570_v12 = vmul.f32 %v561_v6, %v538_v7 }
  0x8c   : > { %v572_v17 = vsel %vm544_vm0, %v536_v5, %v568_v9  ;;  %v574_v18 = vsel %vm546_vm1, %v538_v7, %v570_v12  ;;  %vm957_vm0 = vcmask 15360   ;;  %vm962_vm1 = vcmask 146432  }
  0x8d   : > { %v566_v13 = vpop.permute.xlu0 %565  ;;  %v556_v14 = vpop.permute.xlu1 %555 }
  0x8e   : > { %v571_v15 = vmul.f32 %v566_v13, %v539_v10  ;;  %v569_v16 = vmul.f32 %v556_v14, %v537_v11 }
  0x90   : > { %v575_v19 = vsel %vm547_vm2, %v539_v10, %v571_v15  ;;  %v573_v20 = vsel %vm545_vm3, %v537_v11, %v569_v16  ;;  %vm1485_vm2 = vmpackc.low %vm962_vm1, %vm962_vm1 }
  0x91   : > { %v1637_v21 = vpack.i.bf16 %v575_v19, %v574_v18  ;;  %v1642_v22 = vpack.i.bf16 %v573_v20, %v572_v17  ;;  %v629_v23 = vpack.c.bf16 %v575_v19, %v574_v18  ;;  %v628_v24 = vpack.c.bf16 %v573_v20, %v572_v17 }
  0x93   : > { %1638 = vrot.lane.b32.xlu0 %v1637_v21, %s1736_s22  ;;  %1643 = vrot.lane.b32.xlu1 %v1642_v22, %s1736_s22 }
 0x105   : > { %v1639_v25 = vpop.permute.xlu0 %1638  ;;  %v1644_v26 = vpop.permute.xlu1 %1643 }
 0x106   : > { %v1641_v27 = vunpack.i.h.bf16 %v1639_v25  ;;  %v1640_v28 = vunpack.i.l.bf16 %v1639_v25  ;;  %v1646_v29 = vunpack.i.h.bf16 %v1644_v26  ;;  %v1645_v30 = vunpack.i.l.bf16 %v1644_v26 }
 0x108   : > { %v604_v31 = vsel %vm600_vm4, 0.0, %v1641_v27  ;;  %v603_v32 = vsel %vm600_vm4, 0.0, %v1640_v28  ;;  %v602_v33 = vsel %vm600_vm4, 0.0, %v1646_v29  ;;  %v601_v34 = vsel %vm600_vm4, 0.0, %v1645_v30 }
 0x109   : > { %v609_v35 = vsel %vm605_vm5, %v604_v31, 0.0  ;;  %v608_v36 = vsel %vm605_vm5, %v603_v32, 0.0  ;;  %v1466_v37 = vpack.c.bf16 %v604_v31, %v603_v32  ;;  %v607_v38 = vsel %vm605_vm5, %v602_v33, 0.0 }
 0x10a   : > { %v606_v39 = vsel %vm605_vm5, %v601_v34, 0.0  ;;  %v1469_v40 = vpack.c.bf16 %v602_v33, %v601_v34  ;;  %v1647_v41 = vpack.i.bf16 %v609_v35, %v608_v36 }
 0x10b   : > { %v1652_v42 = vpack.i.bf16 %v607_v38, %v606_v39 }
 0x10c   : > { %1648 = vrot.lane.b32.xlu0 %v1647_v41, %s1737_s23 }
 0x10d   : > { %1653 = vrot.lane.b32.xlu1 %v1652_v42, %s1737_s23 }
 0x110   : > { %644 = vperm.xlu0 %1635, %v582_v43  }
 0x111   : > { %649 = vperm.xlu1 %1636, %v583_v44   ;;  %v760_v44 = vld [vmem:[%s2144_s6 + $0x10] sm:$0xff] }
 0x114   : > { %738 = vperm.xlu0 %1635, %v720_v45   ;;  %v761_v45 = vld [vmem:[%s2144_s6 + $0x18] sm:$0xff] }
 0x115   : > { %743 = vperm.xlu1 %1636, %v721_v46   ;;  %v758_v46 = vld [vmem:[%s2144_s6] sm:$0xff] }
 0x118   : > { %634 = vperm.xlu0 %1635, %v580_v47   ;;  %v759_v47 = vld [vmem:[%s2144_s6 + $0x8] sm:$0xff] }
 0x119   : > { %639 = vperm.xlu1 %1636, %v581_v48   ;;  %v899_v48 = vld [vmem:[%s2145_s7 + $0x10] sm:$0xff] }
 0x11c   : > { %728 = vperm.xlu0 %1635, %v718_v50   ;;  %v897_v50 = vld [vmem:[%s2145_s7] sm:$0xff] }
 0x11d   : > { %733 = vperm.xlu1 %1636, %v719_v51   ;;  %v1719_v51 = vld [vmem:[%s2143_s5] sm:$0xff]  }
 0x11e   : > { %1576 = vmatprep.mubr.msk.bf16.mxu1 %vm662_vm6, %v1719_v51  ;;  %v938_v51 = vld [vmem:[%s2147_s9 + $0x8] sm:$0xff] }
 0x17e   : > { %v1649_v52 = vpop.permute.xlu0 %1648 }
 0x17f   : > { %v1651_v53 = vunpack.i.h.bf16 %v1649_v52  ;;  %v1650_v54 = vunpack.i.l.bf16 %v1649_v52  ;;  %v1654_v55 = vpop.permute.xlu1 %1653  ;;  %v898_v52 = vld [vmem:[%s2145_s7 + $0x8] sm:$0xff] }
 0x180   : > { %v1656_v56 = vunpack.i.h.bf16 %v1654_v55  ;;  %v1655_v57 = vunpack.i.l.bf16 %v1654_v55 }
 0x181   : > { %v631_v58 = vpack.c.bf16 %v1651_v53, %v1650_v54 }
 0x182   : > { %v630_v59 = vpack.c.bf16 %v1656_v56, %v1655_v57 }
 0x183   : > { %1548 = vmatprep.subr.bf16.mxu0 %v631_v58 }
 0x184   : > { %1549 = vmatpush3.bf16.msra.mxu0 %v631_v58 }
 0x185   : > { %1550 = vmatprep.subr.bf16.mxu0 %v630_v59 }
 0x188   : > { %1551 = vmatpush3.bf16.msra.mxu0 %v630_v59 }
 0x189   : > { %1552 = vmatprep.subr.bf16.mxu0 %v629_v23 }
 0x18b   : > { %v645_v62 = vpop.permute.xlu0 %644 }
 0x18c   : > { %1553 = vmatpush3.bf16.msra.mxu0 %v629_v23  ;;  %v650_v63 = vpop.permute.xlu1 %649 }
 0x18d   : > { %1554 = vmatprep.subr.bf16.mxu0 %v628_v24 }
 0x18f   : > { %v739_v0 = vpop.permute.xlu0 %738 }
 0x190   : > { %1555 = vmatpush3.bf16.msra.mxu0 %v628_v24  ;;  %v744_v1 = vpop.permute.xlu1 %743 }
 0x191   : > { %1556 = vmatprep.subr.msk.bf16.mxu0 %vm1895_vm7, %v1466_v37 }
 0x193   : > { %v635_v2 = vpop.permute.xlu0 %634 }
 0x194   : > { %1557 = vmatpush3.bf16.msk.msra.mxu0 %vm1895_vm7, %v1466_v37  ;;  %v640_v5 = vpop.permute.xlu1 %639 }
 0x195   : > { %1558 = vmatprep.subr.msk.bf16.mxu0 %vm1895_vm7, %v1469_v40 }
 0x197   : > { %v729_v11 = vpop.permute.xlu0 %728 }
 0x198   : > { %1559 = vmatpush3.bf16.msk.msra.mxu0 %vm1895_vm7, %v1469_v40  ;;  %v734_v16 = vpop.permute.xlu1 %733 }
 0x19b   : > { %1561 = vmatmul.mubr.msk.bf16.vlgmr.msra.gmra.mxu0 %vm662_vm6, %v1718_v61 }
 0x25b   : > { %v1562_v3 = vpop.f32.mrf.mxu0 }
 0x25c   : > { %v1911_v4 = vadd.f32 %v1562_v3, %v645_v62  ;;  %v1720_v62 = vld [vmem:[%s2143_s5 + $0x8] sm:$0xff]  }
 0x25d   : > { %v703_v6 = vpop.f32.mrf.mxu0 }
 0x25e   : > { %v1913_v7 = vadd.f32 %v703_v6, %v635_v2  ;;  %v748_v9 = vmul.f32 %v739_v0, %v1911_v4  ;;  %vm724_vm8 = vcmp.ge.f32.partialorder %v1911_v4, 0.0 }
 0x25f   : > { %v1563_v8 = vpop.f32.mrf.mxu0 }
 0x260   : > { %v1916_v10 = vadd.f32 %v1563_v8, %v650_v63  ;;  %v746_v13 = vmul.f32 %v729_v11, %v1913_v7  ;;  %vm722_vm10 = vcmp.ge.f32.partialorder %v1913_v7, 0.0  ;;  %v752_v18 = vsel %vm724_vm8, %v1911_v4, %v748_v9 }
 0x261   : > { %v706_v12 = vpop.f32.mrf.mxu0  ;;  %vm1138_vm8 = vcmask 31744  }
 0x262   : > { %v749_v14 = vmul.f32 %v744_v1, %v1916_v10  ;;  %v1921_v15 = vadd.f32 %v706_v12, %v640_v5  ;;  %vm725_vm9 = vcmp.ge.f32.partialorder %v1916_v10, 0.0  ;;  %v750_v22 = vsel %vm722_vm10, %v1913_v7, %v746_v13 }
 0x264   : > { %v747_v17 = vmul.f32 %v734_v16, %v1921_v15  ;;  %v753_v19 = vsel %vm725_vm9, %v1916_v10, %v749_v14  ;;  %vm723_vm11 = vcmp.ge.f32.partialorder %v1921_v15, 0.0  ;;  %vm1143_vm9 = vcmask 162816  }
 0x265   : > { %v1657_v20 = vpack.i.bf16 %v753_v19, %v752_v18  ;;  %v805_v21 = vpack.c.bf16 %v753_v19, %v752_v18  ;;  %vm1495_vm10 = vmpackc.low %vm1143_vm9, %vm1143_vm9 }
 0x266   : > { %v751_v23 = vsel %vm723_vm11, %v1921_v15, %v747_v17  ;;  %vm1304_vm11 = vcmask 261120  }
 0x267   : > { %1658 = vrot.lane.b32.xlu0 %v1657_v20, %s1736_s22  ;;  %v1662_v24 = vpack.i.bf16 %v751_v23, %v750_v22  ;;  %v804_v25 = vpack.c.bf16 %v751_v23, %v750_v22 }
 0x269   : > { %1663 = vrot.lane.b32.xlu1 %v1662_v24, %s1736_s22 }
 0x2d9   : > { %v1659_v26 = vpop.permute.xlu0 %1658 }
 0x2da   : > { %v1661_v27 = vunpack.i.h.bf16 %v1659_v26  ;;  %v1660_v28 = vunpack.i.l.bf16 %v1659_v26 }
 0x2db   : > { %v1664_v29 = vpop.permute.xlu1 %1663 }
 0x2dc   : > { %v781_v30 = vsel %vm600_vm4, 0.0, %v1661_v27  ;;  %v780_v31 = vsel %vm600_vm4, 0.0, %v1660_v28  ;;  %v1666_v32 = vunpack.i.h.bf16 %v1664_v29  ;;  %v1665_v33 = vunpack.i.l.bf16 %v1664_v29 }
 0x2dd   : > { %v785_v34 = vsel %vm605_vm5, %v781_v30, 0.0  ;;  %v784_v35 = vsel %vm605_vm5, %v780_v31, 0.0  ;;  %v1476_v36 = vpack.c.bf16 %v781_v30, %v780_v31 }
 0x2de   : > { %v779_v37 = vsel %vm600_vm4, 0.0, %v1666_v32  ;;  %v778_v38 = vsel %vm600_vm4, 0.0, %v1665_v33  ;;  %v1667_v39 = vpack.i.bf16 %v785_v34, %v784_v35 }
 0x2df   : > { %v783_v40 = vsel %vm605_vm5, %v779_v37, 0.0  ;;  %v782_v41 = vsel %vm605_vm5, %v778_v38, 0.0  ;;  %v1479_v42 = vpack.c.bf16 %v779_v37, %v778_v38 }
 0x2e0   : > { %1668 = vrot.lane.b32.xlu0 %v1667_v39, %s1737_s23  ;;  %v1672_v43 = vpack.i.bf16 %v783_v40, %v782_v41 }
 0x2e2   : > { %1673 = vrot.lane.b32.xlu1 %v1672_v43, %s1737_s23 }
 0x2e4   : > { %820 = vperm.xlu0 %1635, %v760_v44  }
 0x2e6   : > { %825 = vperm.xlu1 %1636, %v761_v45  }
 0x2e8   : > { %810 = vperm.xlu0 %1635, %v758_v46  }
 0x2ea   : > { %815 = vperm.xlu1 %1636, %v759_v47  }
 0x2ec   : > { %917 = vperm.xlu0 %1635, %v899_v48   ;;  %v939_v48 = vld [vmem:[%s2147_s9 + $0x10] sm:$0xff] }
 0x2ee   : > { %922 = vperm.xlu1 %1636, %v900_v49   ;;  %v940_v49 = vld [vmem:[%s2147_s9 + $0x18] sm:$0xff] }
 0x2f0   : > { %907 = vperm.xlu0 %1635, %v897_v50   ;;  %v937_v50 = vld [vmem:[%s2147_s9] sm:$0xff] }
 0x2f2   : > { %912 = vperm.xlu1 %1636, %v898_v52   ;;  %v1080_v52 = vld [vmem:[%s2148_s10 + $0x10] sm:$0xff] }
 0x352   : > { %v1669_v53 = vpop.permute.xlu0 %1668 }
 0x353   : > { %v1671_v54 = vunpack.i.h.bf16 %v1669_v53  ;;  %v1670_v55 = vunpack.i.l.bf16 %v1669_v53  ;;  %v1081_v53 = vld [vmem:[%s2148_s10 + $0x18] sm:$0xff] }
 0x354   : > { %v1674_v56 = vpop.permute.xlu1 %1673 }
 0x355   : > { %v1676_v57 = vunpack.i.h.bf16 %v1674_v56  ;;  %v1675_v58 = vunpack.i.l.bf16 %v1674_v56  ;;  %v807_v59 = vpack.c.bf16 %v1671_v54, %v1670_v55  ;;  %v1078_v54 = vld [vmem:[%s2148_s10] sm:$0xff]  ;;  %v1079_v56 = vld [vmem:[%s2148_s10 + $0x8] sm:$0xff] }
 0x356   : > { %v1721_v55 = vld [vmem:[%s2146_s8] sm:$0xff]  }
 0x357   : > { %v806_v61 = vpack.c.bf16 %v1676_v57, %v1675_v58  ;;  %1564 = vmatprep.subr.bf16.mxu1 %v807_v59  ;;  %1592 = vmatprep.mubr.msk.bf16.mxu0 %vm662_vm6, %v1721_v55  ;;  %v1119_v55 = vld [vmem:[%s2150_s12 + $0x8] sm:$0xff] }
 0x358   : > { %1565 = vmatpush3.bf16.msra.mxu1 %v807_v59 }
 0x359   : > { %1566 = vmatprep.subr.bf16.mxu1 %v806_v61 }
 0x35c   : > { %1567 = vmatpush3.bf16.msra.mxu1 %v806_v61 }
 0x35d   : > { %1568 = vmatprep.subr.bf16.mxu1 %v805_v21 }
 0x35f   : > { %v821_v63 = vpop.permute.xlu0 %820 }
 0x360   : > { %1569 = vmatpush3.bf16.msra.mxu1 %v805_v21 }
 0x361   : > { %1570 = vmatprep.subr.bf16.mxu1 %v804_v25  ;;  %v826_v0 = vpop.permute.xlu1 %825 }
 0x363   : > { %v811_v1 = vpop.permute.xlu0 %810 }
 0x364   : > { %1571 = vmatpush3.bf16.msra.mxu1 %v804_v25 }
 0x365   : > { %1572 = vmatprep.subr.msk.bf16.mxu1 %vm1895_vm7, %v1476_v36  ;;  %v816_v2 = vpop.permute.xlu1 %815 }
 0x367   : > { %v918_v6 = vpop.permute.xlu0 %917 }
 0x368   : > { %1573 = vmatpush3.bf16.msk.msra.mxu1 %vm1895_vm7, %v1476_v36 }
 0x369   : > { %1574 = vmatprep.subr.msk.bf16.mxu1 %vm1895_vm7, %v1479_v42  ;;  %v923_v12 = vpop.permute.xlu1 %922 }
 0x36b   : > { %v908_v20 = vpop.permute.xlu0 %907 }
 0x36c   : > { %1575 = vmatpush3.bf16.msk.msra.mxu1 %vm1895_vm7, %v1479_v42 }
 0x36d   : > { %v913_v22 = vpop.permute.xlu1 %912 }
 0x36f   : > { %1577 = vmatmul.mubr.msk.bf16.vlgmr.msra.gmra.mxu1 %vm662_vm6, %v1720_v62 }
 0x42f   : > { %v1578_v3 = vpop.f32.mrf.mxu1 }
 0x430   : > { %v887_v5 = vadd.f32 %v1578_v3, %v821_v63 }
 0x431   : > { %v878_v8 = vpop.f32.mrf.mxu1 }
 0x432   : > { %v1984_v9 = vadd.f32 %v887_v5, %v1911_v4  ;;  %v879_v11 = vadd.f32 %v878_v8, %v811_v1 }
 0x433   : > { %v1579_v13 = vpop.f32.mrf.mxu1 }
 0x434   : > { %v1987_v14 = vadd.f32 %v879_v11, %v1913_v7  ;;  %v890_v60 = vadd.f32 %v1579_v13, %v826_v0  ;;  %v927_v19 = vmul.f32 %v918_v6, %v1984_v9  ;;  %vm903_vm12 = vcmp.ge.f32.partialorder %v1984_v9, 0.0 }
 0x435   : > { %v881_v16 = vpop.f32.mrf.mxu1 }
 0x436   : > { %v1990_v17 = vadd.f32 %v890_v60, %v1916_v10  ;;  %v882_v18 = vadd.f32 %v881_v16, %v816_v2  ;;  %v925_v7 = vmul.f32 %v908_v20, %v1987_v14  ;;  %vm901_vm14 = vcmp.ge.f32.partialorder %v1987_v14, 0.0  ;;  %v1722_v2 = vld [vmem:[%s2146_s8 + $0x8] sm:$0xff]  }
 0x437   : > { %v931_v10 = vsel %vm903_vm12, %v1984_v9, %v927_v19  ;;  %vm1259_vm12 = vcmask 130048  }
 0x438   : > { %v1995_v4 = vadd.f32 %v882_v18, %v1921_v15  ;;  %vm904_vm13 = vcmp.ge.f32.partialorder %v1990_v17, 0.0  ;;  %v928_v21 = vmul.f32 %v923_v12, %v1990_v17  ;;  %v929_v26 = vsel %vm901_vm14, %v1987_v14, %v925_v7 }
 0x43a   : > { %v932_v23 = vsel %vm904_vm13, %v1990_v17, %v928_v21  ;;  %vm902_vm15 = vcmp.ge.f32.partialorder %v1995_v4, 0.0  ;;  %v926_v24 = vmul.f32 %v913_v22, %v1995_v4 }
 0x43b   : > { %v1677_v25 = vpack.i.bf16 %v932_v23, %v931_v10  ;;  %v986_v15 = vpack.c.bf16 %v932_v23, %v931_v10 }
 0x43c   : > { %v930_v27 = vsel %vm902_vm15, %v1995_v4, %v926_v24 }
 0x43d   : > { %1678 = vrot.lane.b32.xlu0 %v1677_v25, %s1738_s28  ;;  %v1682_v28 = vpack.i.bf16 %v930_v27, %v929_v26  ;;  %v985_v29 = vpack.c.bf16 %v930_v27, %v929_v26 }
 0x43f   : > { %1683 = vrot.lane.b32.xlu1 %v1682_v28, %s1738_s28 }
 0x4af   : > { %v1679_v30 = vpop.permute.xlu0 %1678 }
 0x4b0   : > { %v1681_v31 = vunpack.i.h.bf16 %v1679_v30  ;;  %v1680_v32 = vunpack.i.l.bf16 %v1679_v30 }
 0x4b1   : > { %v1684_v33 = vpop.permute.xlu1 %1683 }
 0x4b2   : > { %v961_v34 = vsel %vm957_vm0, 0.0, %v1681_v31  ;;  %v960_v35 = vsel %vm957_vm0, 0.0, %v1680_v32  ;;  %v1686_v36 = vunpack.i.h.bf16 %v1684_v33  ;;  %v1685_v37 = vunpack.i.l.bf16 %v1684_v33 }
 0x4b3   : > { %v966_v38 = vsel %vm962_vm1, %v961_v34, 0.0  ;;  %v965_v39 = vsel %vm962_vm1, %v960_v35, 0.0  ;;  %v1486_v40 = vpack.c.bf16 %v961_v34, %v960_v35 }
 0x4b4   : > { %v959_v41 = vsel %vm957_vm0, 0.0, %v1686_v36  ;;  %v958_v42 = vsel %vm957_vm0, 0.0, %v1685_v37  ;;  %v1687_v43 = vpack.i.bf16 %v966_v38, %v965_v39 }
 0x4b5   : > { %v964_v44 = vsel %vm962_vm1, %v959_v41, 0.0  ;;  %v963_v45 = vsel %vm962_vm1, %v958_v42, 0.0  ;;  %v1489_v46 = vpack.c.bf16 %v959_v41, %v958_v42 }
 0x4b6   : > { %1688 = vrot.lane.b32.xlu0 %v1687_v43, %s1739_s29  ;;  %v1692_v47 = vpack.i.bf16 %v964_v44, %v963_v45 }
 0x4b8   : > { %1693 = vrot.lane.b32.xlu1 %v1692_v47, %s1739_s29  ;;  %s534_s29 = scalar_lea.vmem %s2154_s16, %s1847_s0 }
 0x4ba   : > { %1001 = vperm.xlu0 %1635, %v939_v48  }
 0x4bc   : > { %1006 = vperm.xlu1 %1636, %v940_v49  }
 0x4be   : > { %991 = vperm.xlu0 %1635, %v937_v50  }
 0x4c0   : > { %996 = vperm.xlu1 %1636, %v938_v51  }
 0x4c2   : > { %1098 = vperm.xlu0 %1635, %v1080_v52   ;;  %v1120_v52 = vld [vmem:[%s2150_s12 + $0x10] sm:$0xff] }
 0x4c4   : > { %1103 = vperm.xlu1 %1636, %v1081_v53   ;;  %v1121_v53 = vld [vmem:[%s2150_s12 + $0x18] sm:$0xff] }
 0x4c6   : > { %1088 = vperm.xlu0 %1635, %v1078_v54   ;;  %v1118_v54 = vld [vmem:[%s2150_s12] sm:$0xff] }
 0x4c8   : > { %1093 = vperm.xlu1 %1636, %v1079_v56   ;;  %v1270_v56 = vld [vmem:[%s2152_s14] sm:$0xff] }
 0x528   : > { %v1689_v57 = vpop.permute.xlu0 %1688 }
 0x529   : > { %v1691_v58 = vunpack.i.h.bf16 %v1689_v57  ;;  %v1690_v59 = vunpack.i.l.bf16 %v1689_v57  ;;  %v1271_v57 = vld [vmem:[%s2152_s14 + $0x8] sm:$0xff] }
 0x52a   : > { %v1694_v61 = vpop.permute.xlu1 %1693 }
 0x52b   : > { %v988_v62 = vpack.c.bf16 %v1691_v58, %v1690_v59  ;;  %v1696_v63 = vunpack.i.h.bf16 %v1694_v61  ;;  %v1695_v0 = vunpack.i.l.bf16 %v1694_v61  ;;  %v1272_v58 = vld [vmem:[%s2152_s14 + $0x10] sm:$0xff]  ;;  %v1723_v59 = vld [vmem:[%s2149_s11] sm:$0xff]   ;;  %v1273_v61 = vld [vmem:[%s2152_s14 + $0x18] sm:$0xff] }
 0x52c   : > { %1608 = vmatprep.mubr.msk.bf16.mxu1 %vm662_vm6, %v1723_v59 }
 0x52d   : > { %v987_v1 = vpack.c.bf16 %v1696_v63, %v1695_v0  ;;  %1580 = vmatprep.subr.bf16.mxu0 %v988_v62 }
 0x52e   : > { %1581 = vmatpush3.bf16.msra.mxu0 %v988_v62 }
 0x52f   : > { %1582 = vmatprep.subr.bf16.mxu0 %v987_v1 }
 0x532   : > { %1583 = vmatpush3.bf16.msra.mxu0 %v987_v1 }
 0x533   : > { %1584 = vmatprep.subr.bf16.mxu0 %v986_v15 }
 0x535   : > { %v1002_v3 = vpop.permute.xlu0 %1001 }
 0x536   : > { %1585 = vmatpush3.bf16.msra.mxu0 %v986_v15 }
 0x537   : > { %1586 = vmatprep.subr.bf16.mxu0 %v985_v29  ;;  %v1007_v5 = vpop.permute.xlu1 %1006 }
 0x539   : > { %v992_v6 = vpop.permute.xlu0 %991 }
 0x53a   : > { %1587 = vmatpush3.bf16.msra.mxu0 %v985_v29 }
 0x53b   : > { %1588 = vmatprep.subr.msk.bf16.mxu0 %vm1485_vm2, %v1486_v40  ;;  %v997_v8 = vpop.permute.xlu1 %996 }
 0x53d   : > { %v1099_v13 = vpop.permute.xlu0 %1098 }
 0x53e   : > { %1589 = vmatpush3.bf16.msk.msra.mxu0 %vm1485_vm2, %v1486_v40 }
 0x53f   : > { %1590 = vmatprep.subr.msk.bf16.mxu0 %vm1485_vm2, %v1489_v46  ;;  %v1104_v19 = vpop.permute.xlu1 %1103 }
 0x541   : > { %v1089_v25 = vpop.permute.xlu0 %1088 }
 0x542   : > { %1591 = vmatpush3.bf16.msk.msra.mxu0 %vm1485_vm2, %v1489_v46 }
 0x543   : > { %v1094_v26 = vpop.permute.xlu1 %1093 }
 0x545   : > { %1593 = vmatmul.mubr.msk.bf16.vlgmr.msra.gmra.mxu0 %vm662_vm6, %v1722_v2 }
 0x605   : > { %v1594_v11 = vpop.f32.mrf.mxu0 }
 0x606   : > { %v1068_v12 = vadd.f32 %v1594_v11, %v1002_v3  ;;  %v1725_v11 = vld [vmem:[%s2151_s13] sm:$0xff]  }
 0x607   : > { %v1059_v60 = vpop.f32.mrf.mxu0  ;;  %1616 = vmatprep.mubr.msk.bf16.mxu0 %vm1304_vm11, %v1725_v11 }
 0x608   : > { %v2046_v16 = vadd.f32 %v1068_v12, %v1984_v9  ;;  %v1060_v18 = vadd.f32 %v1059_v60, %v992_v6 }
 0x609   : > { %v1595_v20 = vpop.f32.mrf.mxu0 }
 0x60a   : > { %v2049_v21 = vadd.f32 %v1060_v18, %v1987_v14  ;;  %v1071_v7 = vadd.f32 %v1595_v20, %v1007_v5  ;;  %v1108_v24 = vmul.f32 %v1099_v13, %v2046_v16  ;;  %vm1084_vm3 = vcmp.ge.f32.partialorder %v2046_v16, 0.0 }
 0x60b   : > { %v1062_v22 = vpop.f32.mrf.mxu0 }
 0x60c   : > { %v2052_v10 = vadd.f32 %v1071_v7, %v1990_v17  ;;  %v1063_v23 = vadd.f32 %v1062_v22, %v997_v8  ;;  %v1106_v14 = vmul.f32 %v1089_v25, %v2049_v21  ;;  %vm1082_vm5 = vcmp.ge.f32.partialorder %v2049_v21, 0.0  ;;  %v1724_v8 = vld [vmem:[%s2149_s11 + $0x8] sm:$0xff]  }
 0x60d   : > { %v1112_v17 = vsel %vm1084_vm3, %v2046_v16, %v1108_v24 }
 0x60e   : > { %v2057_v9 = vadd.f32 %v1063_v23, %v1995_v4  ;;  %vm1085_vm4 = vcmp.ge.f32.partialorder %v2052_v10, 0.0  ;;  %v1109_v15 = vmul.f32 %v1104_v19, %v2052_v10  ;;  %v1110_v30 = vsel %vm1082_vm5, %v2049_v21, %v1106_v14 }
 0x610   : > { %v1113_v27 = vsel %vm1085_vm4, %v2052_v10, %v1109_v15  ;;  %vm1083_vm7 = vcmp.ge.f32.partialorder %v2057_v9, 0.0  ;;  %v1107_v28 = vmul.f32 %v1094_v26, %v2057_v9 }
 0x611   : > { %v1697_v29 = vpack.i.bf16 %v1113_v27, %v1112_v17  ;;  %v1167_v4 = vpack.c.bf16 %v1113_v27, %v1112_v17 }
 0x612   : > { %v1111_v31 = vsel %vm1083_vm7, %v2057_v9, %v1107_v28 }
 0x613   : > { %1698 = vrot.lane.b32.xlu0 %v1697_v29, %s1740_s24  ;;  %v1702_v32 = vpack.i.bf16 %v1111_v31, %v1110_v30  ;;  %v1166_v33 = vpack.c.bf16 %v1111_v31, %v1110_v30 }
 0x615   : > { %1703 = vrot.lane.b32.xlu1 %v1702_v32, %s1740_s24  ;;  %s529_s24 = scalar_lea.vmem %s2153_s15, %s1847_s0 }
 0x685   : > { %v1699_v34 = vpop.permute.xlu0 %1698 }
 0x686   : > { %v1701_v35 = vunpack.i.h.bf16 %v1699_v34  ;;  %v1700_v36 = vunpack.i.l.bf16 %v1699_v34 }
 0x687   : > { %v1704_v37 = vpop.permute.xlu1 %1703 }
 0x688   : > { %v1142_v38 = vsel %vm1138_vm8, 0.0, %v1701_v35  ;;  %v1141_v39 = vsel %vm1138_vm8, 0.0, %v1700_v36  ;;  %v1706_v40 = vunpack.i.h.bf16 %v1704_v37  ;;  %v1705_v41 = vunpack.i.l.bf16 %v1704_v37 }
 0x689   : > { %v1147_v42 = vsel %vm1143_vm9, %v1142_v38, 0.0  ;;  %v1146_v43 = vsel %vm1143_vm9, %v1141_v39, 0.0  ;;  %v1496_v44 = vpack.c.bf16 %v1142_v38, %v1141_v39 }
 0x68a   : > { %v1140_v45 = vsel %vm1138_vm8, 0.0, %v1706_v40  ;;  %v1139_v46 = vsel %vm1138_vm8, 0.0, %v1705_v41  ;;  %v1707_v47 = vpack.i.bf16 %v1147_v42, %v1146_v43 }
 0x68b   : > { %v1145_v48 = vsel %vm1143_vm9, %v1140_v45, 0.0  ;;  %v1144_v49 = vsel %vm1143_vm9, %v1139_v46, 0.0  ;;  %v1499_v50 = vpack.c.bf16 %v1140_v45, %v1139_v46 }
 0x68c   : > { %1708 = vrot.lane.b32.xlu0 %v1707_v47, %s1741_s25  ;;  %v1712_v51 = vpack.i.bf16 %v1145_v48, %v1144_v49 }
 0x68e   : > { %1713 = vrot.lane.b32.xlu1 %v1712_v51, %s1741_s25 }
 0x690   : > { %1182 = vperm.xlu0 %1635, %v1120_v52  }
 0x692   : > { %1187 = vperm.xlu1 %1636, %v1121_v53  }
 0x694   : > { %1172 = vperm.xlu0 %1635, %v1118_v54  }
 0x696   : > { %1177 = vperm.xlu1 %1636, %v1119_v55  }
 0x698   : > { %1276 = vperm.xlu0 %1635, %v1270_v56  }
 0x69a   : > { %1281 = vperm.xlu1 %1636, %v1271_v57  }
 0x69c   : > { %1286 = vperm.xlu0 %1635, %v1272_v58  }
 0x69e   : > { %1291 = vperm.xlu1 %1636, %v1273_v61  }
 0x6fe   : > { %v1709_v62 = vpop.permute.xlu0 %1708 }
 0x6ff   : > { %v1711_v63 = vunpack.i.h.bf16 %v1709_v62  ;;  %v1710_v0 = vunpack.i.l.bf16 %v1709_v62 }
 0x700   : > { %v1714_v1 = vpop.permute.xlu1 %1713 }
 0x701   : > { %v1169_v2 = vpack.c.bf16 %v1711_v63, %v1710_v0  ;;  %v1716_v3 = vunpack.i.h.bf16 %v1714_v1  ;;  %v1715_v5 = vunpack.i.l.bf16 %v1714_v1 }
 0x703   : > { %v1168_v6 = vpack.c.bf16 %v1716_v3, %v1715_v5  ;;  %1596 = vmatprep.subr.bf16.mxu1 %v1169_v2 }
 0x704   : > { %1597 = vmatpush3.bf16.msra.mxu1 %v1169_v2 }
 0x705   : > { %1598 = vmatprep.subr.bf16.mxu1 %v1168_v6 }
 0x708   : > { %1599 = vmatpush3.bf16.msra.mxu1 %v1168_v6 }
 0x709   : > { %1600 = vmatprep.subr.bf16.mxu1 %v1167_v4 }
 0x70b   : > { %v1183_v12 = vpop.permute.xlu0 %1182 }
 0x70c   : > { %1601 = vmatpush3.bf16.msra.mxu1 %v1167_v4 }
 0x70d   : > { %1602 = vmatprep.subr.bf16.mxu1 %v1166_v33  ;;  %v1188_v13 = vpop.permute.xlu1 %1187 }
 0x70f   : > { %v1173_v19 = vpop.permute.xlu0 %1172 }
 0x710   : > { %1603 = vmatpush3.bf16.msra.mxu1 %v1166_v33 }
 0x711   : > { %1604 = vmatprep.subr.msk.bf16.mxu1 %vm1495_vm10, %v1496_v44  ;;  %v1178_v15 = vpop.permute.xlu1 %1177 }
 0x714   : > { %1605 = vmatpush3.bf16.msk.msra.mxu1 %vm1495_vm10, %v1496_v44 }
 0x715   : > { %1606 = vmatprep.subr.msk.bf16.mxu1 %vm1495_vm10, %v1499_v50  ;;  %v1282_v29 = vpop.permute.xlu1 %1281 }
 0x718   : > { %1607 = vmatpush3.bf16.msk.msra.mxu1 %vm1495_vm10, %v1499_v50 }
 0x719   : > { %v1292_v33 = vpop.permute.xlu1 %1291 }
 0x71b   : > { %1609 = vmatmul.mubr.msk.bf16.vlgmr.msra.gmra.mxu1 %vm662_vm6, %v1724_v8 }
 0x7db   : > { %v1610_v60 = vpop.f32.mrf.mxu1 }
 0x7dc   : > { %v1249_v18 = vadd.f32 %v1610_v60, %v1183_v12 }
 0x7dd   : > { %v1240_v20 = vpop.f32.mrf.mxu1 }
 0x7de   : > { %v1257_v7 = vadd.f32 %v1249_v18, %v2046_v16  ;;  %v1241_v22 = vadd.f32 %v1240_v20, %v1173_v19 }
 0x7df   : > { %v1611_v23 = vpop.f32.mrf.mxu1 }
 0x7e0   : > { %1262 = vst.msk [vmem:[%s529_s24 + $0x10] sm:$0xff] %vm1259_vm12, %v1257_v7  ;;  %v1255_v24 = vadd.f32 %v1241_v22, %v2049_v21  ;;  %v1252_v25 = vadd.f32 %v1611_v23, %v1188_v13  ;;  %v1726_v21 = vld [vmem:[%s2151_s13 + $0x8] sm:$0xff]  }
 0x7e1   : > { %v1243_v14 = vpop.f32.mrf.mxu1 }
 0x7e2   : > { %1260 = vst.msk [vmem:[%s529_s24] sm:$0xff] %vm1259_vm12, %v1255_v24  ;;  %v1258_v26 = vadd.f32 %v1252_v25, %v2052_v10  ;;  %v1244_v17 = vadd.f32 %v1243_v14, %v1178_v15  ;;  %v1277_v10 = vpop.permute.xlu0 %1276 }
 0x7e4   : > { %1263 = vst.msk [vmem:[%s529_s24 + $0x18] sm:$0xff] %vm1259_vm12, %v1258_v26  ;;  %v1256_v27 = vadd.f32 %v1244_v17, %v2057_v9  ;;  %v1269_v16 = vpack.c.bf16 %v1258_v26, %v1257_v7 }
 0x7e6   : > { %1261 = vst.msk [vmem:[%s529_s24 + $0x8] sm:$0xff] %vm1259_vm12, %v1256_v27  ;;  %1612 = vmatprep.subr.bf16.mxu0 %v1269_v16  ;;  %v1268_v28 = vpack.c.bf16 %v1256_v27, %v1255_v24  ;;  %v1287_v4 = vpop.permute.xlu0 %1286 }
 0x7e7   : > { %1613 = vmatpush3.bf16.msra.mxu0 %v1269_v16 }
 0x7e8   : > { %1614 = vmatprep.subr.bf16.mxu0 %v1268_v28 }
 0x7eb   : > { %1615 = vmatpush3.bf16.msra.mxu0 %v1268_v28 }
 0x7ee   : > { %1617 = vmatmul.mubr.msk.bf16.vlgmr.msra.gmra.mxu0 %vm1304_vm11, %v1726_v21 }
 0x8ae   : > { %v1618_v9 = vpop.f32.mrf.mxu0 }
 0x8af   : > { %v1354_v30 = vadd.f32 %v1618_v9, %v1287_v4 }
 0x8b0   : > { %v1345_v31 = vpop.f32.mrf.mxu0 }
 0x8b1   : > { %1362 = vst.msk [vmem:[%s534_s29 + $0x10] sm:$0xff] %vm1259_vm12, %v1354_v30  ;;  %v1346_v32 = vadd.f32 %v1345_v31, %v1277_v10 }
 0x8b2   : > { %v1619_v34 = vpop.f32.mrf.mxu0 }
 0x8b3   : > { %1360 = vst.msk [vmem:[%s534_s29] sm:$0xff] %vm1259_vm12, %v1346_v32  ;;  %v1357_v35 = vadd.f32 %v1619_v34, %v1292_v33 }
 0x8b4   : > { %v1348_v36 = vpop.f32.mrf.mxu0 }
 0x8b5   : > { %1363 = vst.msk [vmem:[%s534_s29 + $0x18] sm:$0xff] %vm1259_vm12, %v1357_v35  ;;  %v1349_v37 = vadd.f32 %v1348_v36, %v1282_v29 }
 0x8b7   : > { %1361 = vst.msk [vmem:[%s534_s29 + $0x8] sm:$0xff] %vm1259_vm12, %v1349_v37 }
 0x8b8 PF: > { %s27_s21 = sadd.s32 1, %s1733_s21  }
 0x8b9   : > { %p24_p4 = scmp.ge.s32.totalorder %s27_s21, 4  }
 0x8bb   :  { %26 = sbr.rel (!%p24_p4) target bundleno = 2 (0x2), region = 122 }

</bundles_post_ra>
